<compile_context>
chip_gen: v7x
topology: tpu7x:2x2x1
jax: 0.10.0
libtpu: 0.0.40
codegen_flags: <defaults>
</compile_context>

<pallas_src>
import math

import jax
import jax.numpy as jnp
from jax.experimental import pallas as pl
from jax.experimental.pallas import tpu as pltpu


def _build_pe(d_model: int, max_len: int = 5000, dtype=jnp.float32) -> jnp.ndarray:
    """Reproduce the PyTorch buffer: shape (max_len, 1, d_model)."""
    # The reference module only works for even d_model (its cos slice assignment
    # would shape-mismatch otherwise), so enforce the same constraint.
    assert d_model % 2 == 0, "PositionalEncoding requires an even d_model"
    position = jnp.arange(max_len, dtype=jnp.float32)[:, None]                 # (L, 1)
    div_term = jnp.exp(
        jnp.arange(0, d_model, 2, dtype=jnp.float32)
        * (-math.log(10000.0) / d_model)
    )                                                                          # (D/2,)
    angles = position * div_term                                               # (L, D/2)
    # interleave: even cols = sin, odd cols = cos
    pe = jnp.stack([jnp.sin(angles), jnp.cos(angles)], axis=-1)                # (L, D/2, 2)
    pe = pe.reshape(max_len, d_model)                                          # (L, D)
    return pe[:, None, :].astype(dtype)                                        # (L, 1, D)


def _pe_add_kernel(x_ref, pe_ref, o_ref):
    # x_ref: (TILE_S, B, D); pe_ref: (TILE_S, 1, D) -> broadcast add over the
    # batch (sublane) axis; explicit cast into the output dtype.
    o_ref[...] = (x_ref[...] + pe_ref[...]).astype(o_ref.dtype)


def _choose_tile_s(S: int, B: int, D: int, itemsize: int,
                   vmem_budget_bytes: int) -> int:
    """Largest S-tile whose double-buffered VMEM footprint fits the budget."""
    b_pad = ((B + 7) // 8) * 8            # sublane padding of the batch dim
    d_pad = ((D + 127) // 128) * 128      # lane padding of the model dim
    row_bytes = b_pad * d_pad * itemsize          # one seq row of x / out in VMEM
    pe_row_bytes = 8 * d_pad * itemsize           # one pe row (sublane dim 1 -> 8)
    # (x in + out), each double-buffered, plus pe double-buffered.
    per_row = 2 * 2 * row_bytes + 2 * pe_row_bytes
    tile = max(8, vmem_budget_bytes // per_row)
    tile -= tile % 8                      # keep a tidy multiple of 8
    return int(min(tile, S))


def positional_encoding_forward(x: jnp.ndarray,
                                pe: jnp.ndarray,
                                *,
                                tile_s: int | None = None,
                                vmem_budget_bytes: int = 8 * 1024 * 1024) -> jnp.ndarray:
    """x: (S, B, D); pe: (max_len, 1, D). Returns x + pe[:S] (forward of the module)."""
    S, B, D = x.shape
    max_len = pe.shape[0]
    assert pe.shape == (max_len, 1, D), f"pe shape {pe.shape} incompatible with x {x.shape}"
    assert S <= max_len, f"seq_len {S} exceeds max_len {max_len}"

    # Pre-cast pe so the in-kernel add stays in x.dtype and pe DMA bytes are minimal.
    if pe.dtype != x.dtype:
        pe = pe.astype(x.dtype)

    if tile_s is None:
        tile_s = _choose_tile_s(S, B, D, jnp.dtype(x.dtype).itemsize, vmem_budget_bytes)
    tile_s = max(1, min(tile_s, S))
    grid = (pl.cdiv(S, tile_s),)

    return pl.pallas_call(
        _pe_add_kernel,
        out_shape=jax.ShapeDtypeStruct((S, B, D), x.dtype),
        grid_spec=pltpu.PrefetchScalarGridSpec(
            num_scalar_prefetch=0,
            grid=grid,
            in_specs=[
                # x: tile over the sequence axis.
                pl.BlockSpec((tile_s, B, D), lambda i: (i, 0, 0)),
                # pe: index the full (max_len, 1, D) buffer by S-tile — no
                # wrapper-side slice materialization.
                pl.BlockSpec((tile_s, 1, D), lambda i: (i, 0, 0)),
            ],
            out_specs=pl.BlockSpec((tile_s, B, D), lambda i: (i, 0, 0)),
        ),
        compiler_params=pltpu.CompilerParams(
            # Pure elementwise, no accumulator: safe to shard across TCs (v7x).
            dimension_semantics=("parallel",),
        ),
    )(x, pe)


def _reference(x, pe):
    return x + pe[: x.shape[0], :].astype(x.dtype)


if __name__ == "__main__":
    d_model = 32
    max_len = 128
    seq = 64
    batch = 2

    key = jax.random.PRNGKey(0)
    x = jax.random.normal(key, (seq, batch, d_model), dtype=jnp.float32)
    pe = _build_pe(d_model, max_len)

    # Explicit small tile -> grid=(4,) exercises the pipelined multi-tile path.
    out = positional_encoding_forward(x, pe, tile_s=16)
    out = jax.block_until_ready(out)

    # Auto-sized tile path (whole S in one tile at this tiny shape).
    out_auto = positional_encoding_forward(x, pe)
    out_auto = jax.block_until_ready(out_auto)

    ref = _reference(x, pe)
    assert out.shape == (seq, batch, d_model)
    assert jnp.allclose(out, ref, atol=1e-6, rtol=1e-6)
    assert jnp.allclose(out_auto, ref, atol=1e-6, rtol=1e-6)

    print("KERNEL_OK")
</pallas_src>

<mosaic_0001>
module attributes {stable_mosaic.version = 11 : i64} {
  func.func @_pe_add_kernel(%arg0: i32, %arg1: memref<16x2x32xf32, #tpu.memory_space<vmem>>, %arg2: memref<16x1x32xf32, #tpu.memory_space<vmem>>, %arg3: memref<16x2x32xf32, #tpu.memory_space<vmem>>) attributes {dimension_semantics = [#tpu.dimension_semantics<parallel>], iteration_bounds = array<i64: 4>, scalar_prefetch = 0 : i64, scratch_operands = 0 : i64, tpu.core_type = #tpu.core_type<tc>, window_params = [{transform_indices = @transform_0, window_bounds = array<i64: 16, 2, 32>}, {transform_indices = @transform_1, window_bounds = array<i64: 16, 1, 32>}, {transform_indices = @transform_2, window_bounds = array<i64: 16, 2, 32>}]} {
    %c0 = arith.constant 0 : index
    %c0_0 = arith.constant 0 : index
    %c0_1 = arith.constant 0 : index
    %0 = vector.load %arg1[%c0, %c0_0, %c0_1] : memref<16x2x32xf32, #tpu.memory_space<vmem>>, vector<16x2x32xf32>
    %c0_2 = arith.constant 0 : index
    %c0_3 = arith.constant 0 : index
    %c0_4 = arith.constant 0 : index
    %1 = vector.load %arg2[%c0_2, %c0_3, %c0_4] : memref<16x1x32xf32, #tpu.memory_space<vmem>>, vector<16x1x32xf32>
    %2 = vector.broadcast %1 : vector<16x1x32xf32> to vector<16x2x32xf32>
    %3 = arith.addf %0, %2 : vector<16x2x32xf32>
    %c0_5 = arith.constant 0 : index
    %c0_6 = arith.constant 0 : index
    %c0_7 = arith.constant 0 : index
    %4 = vector.load %arg3[%c0_5, %c0_6, %c0_7] : memref<16x2x32xf32, #tpu.memory_space<vmem>>, vector<16x2x32xf32>
    tpu.vector_store %arg3[%c0_5, %c0_6, %c0_7], %3 {strides = array<i32>} : memref<16x2x32xf32, #tpu.memory_space<vmem>>, vector<16x2x32xf32>,
    return
  }
  func.func @transform_0(%arg0: i32) -> (i32, i32, i32) {
    %c0_i32 = arith.constant 0 : i32
    %c0_i32_0 = arith.constant 0 : i32
    %c0_i32_1 = arith.constant 0 : i32
    return %arg0, %c0_i32, %c0_i32_0 : i32, i32, i32
  }
  func.func @transform_1(%arg0: i32) -> (i32, i32, i32) {
    %c0_i32 = arith.constant 0 : i32
    %c0_i32_0 = arith.constant 0 : i32
    %c0_i32_1 = arith.constant 0 : i32
    return %arg0, %c0_i32, %c0_i32_0 : i32, i32, i32
  }
  func.func @transform_2(%arg0: i32) -> (i32, i32, i32) {
    %c0_i32 = arith.constant 0 : i32
    %c0_i32_0 = arith.constant 0 : i32
    %c0_i32_1 = arith.constant 0 : i32
    return %arg0, %c0_i32, %c0_i32_0 : i32, i32, i32
  }
}

</mosaic_0001>

<bundles_post_ra>
// kernel: tpu_custom_call.1
= control target key start
LH: loop header
LB: loop body
LE: loop exit
PB: predicated region body
PF: predicated region fallthrough
CT: control target
= control target key end

     0   :  { %s451_s9 = smov 0   ;;  %s541_s0 = inlined_call_operand.vmem [shape: f32[64,2,32], index: 0, kind: input, shape index: {}]   ;;  %s542_s1 = inlined_call_operand.vmem [shape: f32[128,1,32], index: 1, kind: input, shape index: {}]   ;;  %s543_s2 = inlined_call_operand.vmem [shape: f32[64,2,32], index: 2, kind: output, shape index: {}]  }
   0x1 LB: > { %s392_s10 = sadd.s32 4294967295, %s434_s9   ;;  %p396_p0 = scmp.ge.s32.totalorder %s434_s9, 1  ;;  %s434_s9 = sphi %s451_s9, %s12_s9  }
   0x2   : > { %p123_p1 = scmp.lt.s32.totalorder %s434_s9, 5 }
   0x4   : > { %p124_p2 = pnand %p396_p0, %p123_p1 }
   0x5   : > { %s397_s11 = sshll.u32 (!%p124_p2), %s392_s10, 4  ;;  %vm310_vm0 = vcmask (!%p124_p2), 254976  }
   0x6   : > { %127 = sbr.rel (%p124_p2) target bundleno = 34 (0x22), region = 28  ;;  %p150_p3 = scmp.lt.s32.totalorder (!%p124_p2), %s397_s11, 63 }
   0x7   : > { %p156_p4 = scmp.lt.s32.totalorder (!%p124_p2), %s397_s11, 127 }
   0xd   : > { %s151_s12 = scalar_select %p150_p3, %s397_s11, 63 }
   0xe   : > { %s545_s11 = smov (!%p156_p4, %s397_s11), 127 }
   0xf   : > { %s398_s13 = sshll.u32 %s151_s12, 1  ;;  %s467_s19 = scalar_lea.vmem %s542_s1, %s545_s11 }
  0x10   : > { %s462_s16 = scalar_lea.vmem %s541_s0, %s398_s13  ;;  %s472_s22 = scalar_lea.vmem %s543_s2, %s398_s13  ;;  %v402_v1 = vld [vmem:[%s467_s19] ss:$0 sm:$0xff]  ;;  %v403_v4 = vld [vmem:[%s467_s19 + $0x1] ss:$0 sm:$0xff]  ;;  %v404_v6 = vld [vmem:[%s467_s19 + $0x2] ss:$0 sm:$0xff] }
  0x11   : > { %v166_v0 = vld [vmem:[%s462_s16] sm:$0x3]  ;;  %v167_v2 = vld [vmem:[%s462_s16 + $0x2] sm:$0x3]  ;;  %v168_v5 = vld [vmem:[%s462_s16 + $0x4] sm:$0x3] }
  0x12   : > { %v294_v3 = vadd.f32 %v402_v1, %v166_v0  ;;  %v295_v7 = vadd.f32 %v403_v4, %v167_v2  ;;  %v296_v8 = vadd.f32 %v404_v6, %v168_v5  ;;  %v169_v9 = vld [vmem:[%s462_s16 + $0x6] sm:$0x3]  ;;  %v405_v10 = vld [vmem:[%s467_s19 + $0x3] ss:$0 sm:$0xff]  ;;  %v170_v11 = vld [vmem:[%s462_s16 + $0x8] sm:$0x3] }
  0x13   : > { %v297_v12 = vadd.f32 %v405_v10, %v169_v9  ;;  %v406_v13 = vld [vmem:[%s467_s19 + $0x4] ss:$0 sm:$0xff]  ;;  %v171_v14 = vld [vmem:[%s462_s16 + $0xa] sm:$0x3]  ;;  %v407_v15 = vld [vmem:[%s467_s19 + $0x5] ss:$0 sm:$0xff] }
  0x14   : > { %311 = vst.msk [vmem:[%s472_s22] sm:$0x3] %vm310_vm0, %v294_v3  ;;  %312 = vst.msk [vmem:[%s472_s22 + $0x2] sm:$0x3] %vm310_vm0, %v295_v7  ;;  %v298_v16 = vadd.f32 %v406_v13, %v170_v11  ;;  %v299_v17 = vadd.f32 %v407_v15, %v171_v14  ;;  %v172_v18 = vld [vmem:[%s462_s16 + $0xc] sm:$0x3] }
  0x15   : > { %313 = vst.msk [vmem:[%s472_s22 + $0x4] sm:$0x3] %vm310_vm0, %v296_v8  ;;  %v408_v19 = vld [vmem:[%s467_s19 + $0x6] ss:$0 sm:$0xff]  ;;  %v173_v20 = vld [vmem:[%s462_s16 + $0xe] sm:$0x3] }
  0x16   : > { %314 = vst.msk [vmem:[%s472_s22 + $0x6] sm:$0x3] %vm310_vm0, %v297_v12  ;;  %v300_v21 = vadd.f32 %v408_v19, %v172_v18  ;;  %v409_v22 = vld [vmem:[%s467_s19 + $0x7] ss:$0 sm:$0xff]  ;;  %v174_v23 = vld [vmem:[%s462_s16 + $0x10] sm:$0x3] }
  0x17   : > { %v410_v24 = vld [vmem:[%s467_s19 + $0x8] ss:$0 sm:$0xff]  ;;  %315 = vst.msk [vmem:[%s472_s22 + $0x8] sm:$0x3] %vm310_vm0, %v298_v16  ;;  %316 = vst.msk [vmem:[%s472_s22 + $0xa] sm:$0x3] %vm310_vm0, %v299_v17  ;;  %v301_v25 = vadd.f32 %v409_v22, %v173_v20 }
  0x18   : > { %v302_v26 = vadd.f32 %v410_v24, %v174_v23  ;;  %v175_v27 = vld [vmem:[%s462_s16 + $0x12] sm:$0x3]  ;;  %v411_v28 = vld [vmem:[%s467_s19 + $0x9] ss:$0 sm:$0xff]  ;;  %v176_v29 = vld [vmem:[%s462_s16 + $0x14] sm:$0x3] }
  0x19   : > { %317 = vst.msk [vmem:[%s472_s22 + $0xc] sm:$0x3] %vm310_vm0, %v300_v21  ;;  %v303_v30 = vadd.f32 %v411_v28, %v175_v27  ;;  %v412_v31 = vld [vmem:[%s467_s19 + $0xa] ss:$0 sm:$0xff]  ;;  %v177_v32 = vld [vmem:[%s462_s16 + $0x16] sm:$0x3] }
  0x1a   : > { %v413_v33 = vld [vmem:[%s467_s19 + $0xb] ss:$0 sm:$0xff]  ;;  %318 = vst.msk [vmem:[%s472_s22 + $0xe] sm:$0x3] %vm310_vm0, %v301_v25  ;;  %319 = vst.msk [vmem:[%s472_s22 + $0x10] sm:$0x3] %vm310_vm0, %v302_v26  ;;  %v304_v34 = vadd.f32 %v412_v31, %v176_v29 }
  0x1b   : > { %v305_v35 = vadd.f32 %v413_v33, %v177_v32  ;;  %v178_v36 = vld [vmem:[%s462_s16 + $0x18] sm:$0x3]  ;;  %v414_v37 = vld [vmem:[%s467_s19 + $0xc] ss:$0 sm:$0xff]  ;;  %v179_v38 = vld [vmem:[%s462_s16 + $0x1a] sm:$0x3] }
  0x1c   : > { %320 = vst.msk [vmem:[%s472_s22 + $0x12] sm:$0x3] %vm310_vm0, %v303_v30  ;;  %v306_v39 = vadd.f32 %v414_v37, %v178_v36  ;;  %v415_v40 = vld [vmem:[%s467_s19 + $0xd] ss:$0 sm:$0xff]  ;;  %v180_v41 = vld [vmem:[%s462_s16 + $0x1c] sm:$0x3] }
  0x1d   : > { %v416_v42 = vld [vmem:[%s467_s19 + $0xe] ss:$0 sm:$0xff]  ;;  %321 = vst.msk [vmem:[%s472_s22 + $0x14] sm:$0x3] %vm310_vm0, %v304_v34  ;;  %322 = vst.msk [vmem:[%s472_s22 + $0x16] sm:$0x3] %vm310_vm0, %v305_v35  ;;  %v307_v43 = vadd.f32 %v415_v40, %v179_v38 }
  0x1e   : > { %v308_v44 = vadd.f32 %v416_v42, %v180_v41  ;;  %v181_v45 = vld [vmem:[%s462_s16 + $0x1e] sm:$0x3]  ;;  %v417_v46 = vld [vmem:[%s467_s19 + $0xf] ss:$0 sm:$0xff]  ;;  %323 = vst.msk [vmem:[%s472_s22 + $0x18] sm:$0x3] %vm310_vm0, %v306_v39 }
  0x1f   : > { %v309_v47 = vadd.f32 %v417_v46, %v181_v45  ;;  %324 = vst.msk [vmem:[%s472_s22 + $0x1a] sm:$0x3] %vm310_vm0, %v307_v43 }
  0x20   : > { %325 = vst.msk [vmem:[%s472_s22 + $0x1c] sm:$0x3] %vm310_vm0, %v308_v44 }
  0x21   : > { %326 = vst.msk [vmem:[%s472_s22 + $0x1e] sm:$0x3] %vm310_vm0, %v309_v47 }
  0x22 PF: > { %s12_s9 = sadd.s32 1, %s434_s9  }
  0x23   : > { %p9_p5 = scmp.ge.s32.totalorder %s12_s9, 6  }
  0x25   :  { %11 = sbr.rel (!%p9_p5) target bundleno = 1 (0x1), region = 61 }

</bundles_post_ra>
